<compile_context>
chip_gen: v7x
topology: tpu7x:2x2x1
jax: 0.10.0
libtpu: 0.0.40
codegen_flags: <defaults>
</compile_context>

<pallas_src>
import math

import jax
import jax.numpy as jnp
from jax import lax
from jax.experimental import pallas as pl
from jax.experimental.pallas import tpu as pltpu

EPS = 1e-5  # PyTorch InstanceNorm2d default


def _adaptive_norm_kernel(w0_ref, a_ref, b_ref, x_ref, o_ref):
    # x_ref/o_ref: (R, HW) VMEM tiles; a_ref/b_ref: (R, 1) VMEM columns
    # (a = w1*gamma, b = w1*beta per (n,c) row); w0_ref: (1,) SMEM scalar.
    w0 = w0_ref[0]

    x = x_ref[...].astype(jnp.float32)
    inv_hw = 1.0 / float(x.shape[-1])

    # Two-pass per-row statistics (keeps PyTorch-matching numerics; avoids
    # catastrophic cancellation of the E[x^2]-mean^2 form).
    mean = jnp.sum(x, axis=-1, keepdims=True) * inv_hw
    xc = x - mean
    var = jnp.sum(xc * xc, axis=-1, keepdims=True) * inv_hw   # biased var (IN)
    inv_std = lax.rsqrt(var + EPS)

    # out = w0*x + (w1*gamma)*xc*inv_std + w1*beta   (single fused epilogue,
    # per-row scale folded before the broadcast so it's one (R,1) mul).
    scale = a_ref[...] * inv_std                               # (R, 1)
    out = w0 * x + scale * xc + b_ref[...]
    o_ref[...] = out.astype(o_ref.dtype)


def adaptive_norm(x, w0, w1, gamma, beta, *, block_rows=256):
    """x: (N, C, H, W); w0, w1: (1,); gamma, beta: (C,)."""
    N, C, H, W = x.shape
    NC, HW = N * C, H * W

    # Lane-dense, contiguous reshape (free).
    xf = x.reshape(NC, HW)

    # Fold w1 into per-row scale/offset columns (row r = n*C + c -> channel c).
    w1f = w1.astype(jnp.float32)[0]
    a_nc = jnp.tile(w1f * gamma.astype(jnp.float32), N).reshape(NC, 1)
    b_nc = jnp.tile(w1f * beta.astype(jnp.float32), N).reshape(NC, 1)

    # Row-block size: multiple of 8, capped so one input block stays ~<= 4 MiB
    # (keeps 2x in + 2x out double buffers well under the v7x 64 MiB VMEM).
    bytes_per_row = HW * 4
    max_rows_by_vmem = max(8, (4 * 1024 * 1024) // max(bytes_per_row, 1))
    R = min(block_rows, max_rows_by_vmem)
    R = max(8, (R // 8) * 8)
    if NC <= R:
        R = ((NC + 7) // 8) * 8  # single block, still a multiple of 8

    NC_pad = ((NC + R - 1) // R) * R
    if NC_pad != NC:
        pad = NC_pad - NC
        xf = jnp.pad(xf, ((0, pad), (0, 0)))
        a_nc = jnp.pad(a_nc, ((0, pad), (0, 0)))
        b_nc = jnp.pad(b_nc, ((0, pad), (0, 0)))

    out = pl.pallas_call(
        _adaptive_norm_kernel,
        out_shape=jax.ShapeDtypeStruct((NC_pad, HW), x.dtype),
        grid_spec=pltpu.PrefetchScalarGridSpec(
            num_scalar_prefetch=0,
            grid=(NC_pad // R,),
            in_specs=[
                pl.BlockSpec(memory_space=pltpu.MemorySpace.SMEM),  # w0 (1,)
                pl.BlockSpec((R, 1), lambda i: (i, 0)),             # a = w1*gamma
                pl.BlockSpec((R, 1), lambda i: (i, 0)),             # b = w1*beta
                pl.BlockSpec((R, HW), lambda i: (i, 0)),            # x rows
            ],
            out_specs=pl.BlockSpec((R, HW), lambda i: (i, 0)),
        ),
        compiler_params=pltpu.CompilerParams(
            dimension_semantics=("parallel",),        # lets v7x split rows over 2 TCs
            vmem_limit_bytes=48 * 1024 * 1024,        # > v6e default, < v7x physical
        ),
    )(w0.astype(jnp.float32), a_nc, b_nc, xf)

    return out[:NC].reshape(N, C, H, W)


def adaptive_norm_ref(x, w0, w1, gamma, beta):
    """Pure-JAX reference mirroring the PyTorch forward."""
    xf = x.astype(jnp.float32)
    mean = jnp.mean(xf, axis=(2, 3), keepdims=True)
    var = jnp.mean((xf - mean) ** 2, axis=(2, 3), keepdims=True)
    normed = (xf - mean) * lax.rsqrt(var + EPS)
    normed = normed * gamma[None, :, None, None] + beta[None, :, None, None]
    return (w0[0] * xf + w1[0] * normed).astype(x.dtype)


if __name__ == "__main__":
    key = jax.random.PRNGKey(0)
    N, C, H, W = 2, 4, 16, 16
    x = jax.random.normal(key, (N, C, H, W), dtype=jnp.float32)

    # Parameters initialized exactly as AdaptiveNorm.__init__ does:
    #   w_0 = 1.0, w_1 = 0.0, InstanceNorm2d affine: gamma = 1, beta = 0.
    w0 = jnp.array([1.0], dtype=jnp.float32)
    w1 = jnp.array([0.0], dtype=jnp.float32)
    gamma = jnp.ones((C,), dtype=jnp.float32)
    beta = jnp.zeros((C,), dtype=jnp.float32)

    out = jax.block_until_ready(adaptive_norm(x, w0, w1, gamma, beta))
    ref = adaptive_norm_ref(x, w0, w1, gamma, beta)
    assert jnp.allclose(out, ref, atol=1e-5, rtol=1e-5)

    # Exercise the normalization path with non-trivial (still deterministic) params.
    w0b = jnp.array([0.7], dtype=jnp.float32)
    w1b = jnp.array([0.3], dtype=jnp.float32)
    gammab = jnp.linspace(0.5, 1.5, C, dtype=jnp.float32)
    betab = jnp.linspace(-0.2, 0.2, C, dtype=jnp.float32)
    out2 = jax.block_until_ready(adaptive_norm(x, w0b, w1b, gammab, betab))
    ref2 = adaptive_norm_ref(x, w0b, w1b, gammab, betab)
    assert jnp.allclose(out2, ref2, atol=1e-5, rtol=1e-5)

    # Also exercise multi-block / padded path (NC not a multiple of the row block).
    N3, C3 = 3, 5
    x3 = jax.random.normal(jax.random.PRNGKey(1), (N3, C3, H, W), dtype=jnp.float32)
    g3 = jnp.linspace(0.8, 1.2, C3, dtype=jnp.float32)
    b3 = jnp.linspace(-0.1, 0.1, C3, dtype=jnp.float32)
    out3 = jax.block_until_ready(adaptive_norm(x3, w0b, w1b, g3, b3, block_rows=8))
    ref3 = adaptive_norm_ref(x3, w0b, w1b, g3, b3)
    assert jnp.allclose(out3, ref3, atol=1e-5, rtol=1e-5)

    print("KERNEL_OK")
</pallas_src>

<mosaic_0001>
module attributes {stable_mosaic.version = 11 : i64} {
  func.func @_adaptive_norm_kernel(%arg0: i32, %arg1: memref<1xf32, #tpu.memory_space<smem>>, %arg2: memref<8x1xf32, #tpu.memory_space<vmem>>, %arg3: memref<8x1xf32, #tpu.memory_space<vmem>>, %arg4: memref<8x256xf32, #tpu.memory_space<vmem>>, %arg5: memref<8x256xf32, #tpu.memory_space<vmem>>) attributes {dimension_semantics = [#tpu.dimension_semantics<parallel>], iteration_bounds = array<i64: 1>, scalar_prefetch = 0 : i64, scratch_operands = 0 : i64, tpu.core_type = #tpu.core_type<tc>, window_params = [{transform_indices = @transform_0, window_bounds = array<i64: 1>}, {transform_indices = @transform_1, window_bounds = array<i64: 8, 1>}, {transform_indices = @transform_2, window_bounds = array<i64: 8, 1>}, {transform_indices = @transform_3, window_bounds = array<i64: 8, 256>}, {transform_indices = @transform_4, window_bounds = array<i64: 8, 256>}]} {
    %c0 = arith.constant 0 : index
    %0 = memref.load %arg1[%c0] : memref<1xf32, #tpu.memory_space<smem>>
    %c0_0 = arith.constant 0 : index
    %c0_1 = arith.constant 0 : index
    %1 = vector.load %arg4[%c0_0, %c0_1] : memref<8x256xf32, #tpu.memory_space<vmem>>, vector<8x256xf32>
    %cst = arith.constant dense<0.000000e+00> : vector<8xf32>
    %2 = vector.multi_reduction <add>, %1, %cst [1] : vector<8x256xf32> to vector<8xf32>
    %3 = vector.shape_cast %2 : vector<8xf32> to vector<8x1xf32>
    %cst_2 = arith.constant 3.906250e-03 : f32
    %4 = vector.broadcast %cst_2 : f32 to vector<8x1xf32>
    %5 = arith.mulf %3, %4 : vector<8x1xf32>
    %6 = vector.broadcast %5 : vector<8x1xf32> to vector<8x256xf32>
    %7 = arith.subf %1, %6 : vector<8x256xf32>
    %8 = arith.mulf %7, %7 : vector<8x256xf32>
    %cst_3 = arith.constant dense<0.000000e+00> : vector<8xf32>
    %9 = vector.multi_reduction <add>, %8, %cst_3 [1] : vector<8x256xf32> to vector<8xf32>
    %10 = vector.shape_cast %9 : vector<8xf32> to vector<8x1xf32>
    %cst_4 = arith.constant 3.906250e-03 : f32
    %11 = vector.broadcast %cst_4 : f32 to vector<8x1xf32>
    %12 = arith.mulf %10, %11 : vector<8x1xf32>
    %cst_5 = arith.constant 9.99999974E-6 : f32
    %13 = vector.broadcast %cst_5 : f32 to vector<8x1xf32>
    %14 = arith.addf %12, %13 : vector<8x1xf32>
    %15 = math.rsqrt %14 : vector<8x1xf32>
    %c0_6 = arith.constant 0 : index
    %c0_7 = arith.constant 0 : index
    %16 = vector.load %arg2[%c0_6, %c0_7] : memref<8x1xf32, #tpu.memory_space<vmem>>, vector<8x1xf32>
    %17 = arith.mulf %16, %15 : vector<8x1xf32>
    %18 = vector.broadcast %0 : f32 to vector<8x256xf32>
    %19 = arith.mulf %18, %1 : vector<8x256xf32>
    %20 = vector.broadcast %17 : vector<8x1xf32> to vector<8x256xf32>
    %21 = arith.mulf %20, %7 : vector<8x256xf32>
    %22 = arith.addf %19, %21 : vector<8x256xf32>
    %c0_8 = arith.constant 0 : index
    %c0_9 = arith.constant 0 : index
    %23 = vector.load %arg3[%c0_8, %c0_9] : memref<8x1xf32, #tpu.memory_space<vmem>>, vector<8x1xf32>
    %24 = vector.broadcast %23 : vector<8x1xf32> to vector<8x256xf32>
    %25 = arith.addf %22, %24 : vector<8x256xf32>
    %c0_10 = arith.constant 0 : index
    %c0_11 = arith.constant 0 : index
    %26 = vector.load %arg5[%c0_10, %c0_11] : memref<8x256xf32, #tpu.memory_space<vmem>>, vector<8x256xf32>
    tpu.vector_store %arg5[%c0_10, %c0_11], %25 {strides = array<i32>} : memref<8x256xf32, #tpu.memory_space<vmem>>, vector<8x256xf32>,
    return
  }
  func.func @transform_0(%arg0: i32) -> i32 {
    %c0_i32 = arith.constant 0 : i32
    %c0_i32_0 = arith.constant 0 : i32
    return %c0_i32 : i32
  }
  func.func @transform_1(%arg0: i32) -> (i32, i32) {
    %c0_i32 = arith.constant 0 : i32
    %c0_i32_0 = arith.constant 0 : i32
    return %arg0, %c0_i32 : i32, i32
  }
  func.func @transform_2(%arg0: i32) -> (i32, i32) {
    %c0_i32 = arith.constant 0 : i32
    %c0_i32_0 = arith.constant 0 : i32
    return %arg0, %c0_i32 : i32, i32
  }
  func.func @transform_3(%arg0: i32) -> (i32, i32) {
    %c0_i32 = arith.constant 0 : i32
    %c0_i32_0 = arith.constant 0 : i32
    return %arg0, %c0_i32 : i32, i32
  }
  func.func @transform_4(%arg0: i32) -> (i32, i32) {
    %c0_i32 = arith.constant 0 : i32
    %c0_i32_0 = arith.constant 0 : i32
    return %arg0, %c0_i32 : i32, i32
  }
}

</mosaic_0001>

<bundles_post_ra>
// kernel: tpu_custom_call.1
= control target key start
LH: loop header
LB: loop body
LE: loop exit
PB: predicated region body
PF: predicated region fallthrough
CT: control target
= control target key end

     0   :  { %s158_s0 = inlined_call_operand.<no memory space> [shape: f32[1], index: 0, kind: input, shape index: {}]   ;;  %s159_s1 = inlined_call_operand.vmem [shape: f32[8,1], index: 1, kind: input, shape index: {}]   ;;  %s160_s2 = inlined_call_operand.vmem [shape: f32[8,1], index: 2, kind: input, shape index: {}]   ;;  %s161_s3 = inlined_call_operand.vmem [shape: f32[8,256], index: 3, kind: input, shape index: {}]   ;;  %s162_s4 = inlined_call_operand.hbm [shape: f32[8,256], index: 4, kind: output, shape index: {}]  }
   0x1   :  { %v20_v0 = vld [vmem:[%s161_s3] sm:$0xff]  ;;  %v21_v1 = vld [vmem:[%s161_s3 + $0x8] sm:$0xff] }
   0x2   :  { %10 = vsyncpa [#allocation4], 0  ;;  %v22_v2 = vadd.f32 %v21_v1, %v20_v0  ;;  %v104_v10 = vmov 0   ;;  %v36_v14 = vld [vmem:[%s159_s1] sm:$0xff]  ;;  %v38_v18 = vstv %s158_s0  ;;  %s105_s24 = smov [#allocation3]  }
   0x3   :  { %76 = vset.pattern.permute.xlu1 %v104_v10  ;;  %77 = vset.pattern.permute.xlu0 %v104_v10  ;;  %v50_v17 = vld [vmem:[%s160_s2] sm:$0xff]  ;;  %v39_v19 = vmul.f32 %v38_v18, %v20_v0  ;;  %v40_v20 = vmul.f32 %v38_v18, %v21_v1  ;;  %s66_s25 = sshll.u32 %s105_s24, 4  ;;  %s67_s25 = int_to_ptr.vmem [resolvable:$true] %s66_s25 }
   0x4   :  { %23 = vadd.xlane.f32.xlu0 %v22_v2  ;;  %s80_s1 = scalar_lea.vmem %s67_s25, 256  ;;  %p85_p1 = scmp.lt.s32.totalorder %s67_s25, %s67_s25 }
   0x5   :  { %p81_p0 = scmp.ne.s32.totalorder %s67_s25, %s80_s1  ;;  %p86_p2 = scmp.lt.s32.totalorder %s80_s1, %s80_s1 }
   0x7   :  { %p87_p3 = por %p86_p2, %p85_p1 }
   0x9   :  { %p88_p4 = pnand %p87_p3, %p81_p0 }
  0x91   :  { %v24_v3 = vpop.xlane.xlu0 %23 }
  0x92   :  { %v25_v4 = vmul.f32 0.00390625, %v24_v3 }
  0x94   :  { %v26_v5 = vsub.f32 %v20_v0, %v25_v4  ;;  %v27_v6 = vsub.f32 %v21_v1, %v25_v4 }
  0x96   :  { %v28_v7 = vmul.f32 %v26_v5, %v26_v5  ;;  %v29_v8 = vmul.f32 %v27_v6, %v27_v6 }
  0x98   :  { %v30_v9 = vadd.f32 %v29_v8, %v28_v7 }
  0x9a   :  { %31 = vadd.xlane.f32.xlu0 %v30_v9 }
 0x127   :  { %v32_v11 = vpop.xlane.xlu0 %31 }
 0x128   :  { %v33_v12 = vmul.f32 0.00390625, %v32_v11 }
 0x12a   :  { %v34_v13 = vadd.f32 1e-05, %v33_v12 }
 0x12c   :  { %78 = vrsqrt.f32 %v34_v13 }
 0x136   :  { %v79_v15 = vpop.eup %78 }
 0x137   :  { %v37_v16 = vmul.f32 %v79_v15, %v36_v14 }
 0x139   :  { %43 = vperm.xlu1 %76, %v37_v16  }
 0x13d   :  { %53 = vperm.xlu1 %76, %v50_v17  }
 0x1b8   :  { %v44_v21 = vpop.permute.xlu1 %43 }
 0x1b9   :  { %v46_v22 = vmul.f32 %v44_v21, %v26_v5  ;;  %v47_v23 = vmul.f32 %v44_v21, %v27_v6 }
 0x1bb   :  { %v48_v24 = vadd.f32 %v46_v22, %v39_v19  ;;  %v49_v25 = vadd.f32 %v47_v23, %v40_v20 }
 0x1bc   :  { %v54_v26 = vpop.permute.xlu1 %53 }
 0x1bd   :  { %v56_v27 = vadd.f32 %v54_v26, %v48_v24  ;;  %v57_v28 = vadd.f32 %v54_v26, %v49_v25 }
 0x1bf   :  { %58 = vst [vmem:[#allocation3] sm:$0xff] %v56_v27  ;;  %59 = vst [vmem:[#allocation3 + $0x8] sm:$0xff] %v57_v28 }
 0x1c0   :  { %91 = shalt.err (!%p88_p4)
}
 0x1c1   :  { %s92_s26 = scalar_lea.hbm %s162_s4, 256 }
 0x1c2   :  { %p93_p5 = scmp.ne.s32.totalorder %s162_s4, %s92_s26  ;;  %p96_p6 = scmp.lt.u32.totalorder %s92_s26, %s162_s4 }
 0x1c4   :  { %p98_p7 = pnand %p96_p6, %p93_p5 }
 0x1c6   :  { %101 = shalt.err (!%p98_p7)
}
 0x1c7   :  { %69 = dma.vmem_to_hbm [thread:$0]  %s67_s25, 256, %s162_s4, [#allocation4]  }
 0x1c8   :  { %102 = dma.done.wait [#allocation4], 256  }
 0x1c9   :  { %103 = vsyncadd [#allocation4], 4294967040 }
 0x1ca   :  { %73 = vsyncpa [#allocation4], 1 }

</bundles_post_ra>
